<compile_context>
chip_gen: v7x
topology: tpu7x:2x2x1
jax: 0.10.0
libtpu: 0.0.40
codegen_flags: <defaults>
</compile_context>

<pallas_src>
import jax
import jax.numpy as jnp
from jax.experimental import pallas as pl
from jax.experimental.pallas import tpu as pltpu

EMBED_SIZE = 4  # self.embed_size in the PyTorch module

# Per-block byte budget (per buffer). 2 MiB keeps input+output, each
# double-buffered, around ~8 MiB of VMEM: inside v5e's 16 MiB scoped default
# and far under v6e's 32 MiB default / v7x's 64 MiB physical VMEM.
_BLOCK_BYTES = 2 * 1024 * 1024


def _copy_kernel(x_ref, o_ref):
    # Whole-tile copy: lane-dense load + unmasked store.
    o_ref[...] = x_ref[...]


def _pick_lane_width(total_elems):
    """Largest lane-dense row width (multiple of 128) that divides the array."""
    for c in (2048, 1024, 512, 256, 128):
        if total_elems % c == 0:
            return c
    return None


def _pick_tile_rows(m, c, itemsize):
    """Largest sublane-aligned row tile that divides M and fits the block budget."""
    max_rows = max(1, _BLOCK_BYTES // (c * itemsize))
    for tm in (1024, 512, 256, 128, 64, 32, 16, 8):
        if tm <= max_rows and m % tm == 0:
            return tm
    # Fallback: full extent is always a legal block shape (only hit for odd /
    # tiny M, where the whole slab is small anyway).
    return m


def _pallas_copy_2d(x2d):
    m, c = x2d.shape
    tm = _pick_tile_rows(m, c, x2d.dtype.itemsize)
    grid = (m // tm,)
    return pl.pallas_call(
        _copy_kernel,
        out_shape=jax.ShapeDtypeStruct((m, c), x2d.dtype),
        grid=grid,
        in_specs=[pl.BlockSpec((tm, c), lambda i: (i, 0))],
        out_specs=pl.BlockSpec((tm, c), lambda i: (i, 0)),
        compiler_params=pltpu.CompilerParams(
            # Row tiles are independent -> shard across v7x's 2 TensorCores.
            dimension_semantics=("parallel",),
        ),
    )(x2d)


def _pallas_copy(x):
    """Materialize a copy of `x` via a lane-dense tiled Pallas copy."""
    total = x.size
    c = _pick_lane_width(total)
    if c is None:
        # Element count not a multiple of 128: single full-array block copy.
        flat = x.reshape(1, total)
        out = pl.pallas_call(
            _copy_kernel,
            out_shape=jax.ShapeDtypeStruct(flat.shape, flat.dtype),
        )(flat)
        return out.reshape(x.shape)
    # Row-major flatten / unflatten: pure re-view of the same element order,
    # so identity semantics are exactly preserved (no transpose anywhere).
    x2d = x.reshape(total // c, c)
    return _pallas_copy_2d(x2d).reshape(x.shape)


def canvas_encoder(canvas: jax.Array, *, copy: bool = False) -> jax.Array:
    """Pallas equivalent of CanvasEncoder.forward(canvas).

    Default (`copy=False`): returns the input unchanged — zero HBM traffic,
    matching the torch module's identity semantics exactly.

    `copy=True`: returns a freshly materialized buffer via a lane-dense,
    tiled, pipelined Pallas copy (useful when the caller needs a new buffer,
    e.g. because the input is about to be donated or overwritten in place).
    """
    # Mirror: assert result.size(2) == self.embed_size (trace-time check).
    assert canvas.shape[2] == EMBED_SIZE, (
        f"canvas.shape[2] must be {EMBED_SIZE}, got {canvas.shape[2]}"
    )
    if not copy:
        return canvas
    return _pallas_copy(canvas)


if __name__ == "__main__":
    key = jax.random.PRNGKey(0)
    k_small, k_large = jax.random.split(key)

    # Small canvas consistent with the module: axis 2 == embed_size == 4.
    # (B=2, N=8, embed=4, F=16)
    canvas_small = jax.random.normal(
        k_small, (2, 8, EMBED_SIZE, 16), dtype=jnp.float32
    )

    # 1) Default identity path (zero-copy, optimal for a pass-through module).
    out_identity = canvas_encoder(canvas_small)
    out_identity = jax.block_until_ready(out_identity)
    assert out_identity.shape == canvas_small.shape
    assert out_identity.dtype == canvas_small.dtype
    assert bool(jnp.all(out_identity == canvas_small))

    # 2) Pallas copy path on the small canvas (single lane-dense block).
    out_small = canvas_encoder(canvas_small, copy=True)
    out_small = jax.block_until_ready(out_small)
    assert out_small.shape == canvas_small.shape
    assert out_small.dtype == canvas_small.dtype
    assert bool(jnp.all(out_small == canvas_small))

    # 3) Pallas copy path on a larger canvas: exercises the multi-step tiled
    #    grid (lane width 2048, 256-row tiles, double-buffered, "parallel").
    canvas_large = jax.random.normal(
        k_large, (4, 512, EMBED_SIZE, 128), dtype=jnp.float32
    )
    out_large = canvas_encoder(canvas_large, copy=True)
    out_large = jax.block_until_ready(out_large)
    assert out_large.shape == canvas_large.shape
    assert out_large.dtype == canvas_large.dtype
    assert bool(jnp.all(out_large == canvas_large))

    print("KERNEL_OK")
</pallas_src>

<mosaic_0001>
module attributes {stable_mosaic.version = 11 : i64} {
  func.func @_copy_kernel(%arg0: i32, %arg1: memref<1x1024xf32, #tpu.memory_space<vmem>>, %arg2: memref<1x1024xf32, #tpu.memory_space<vmem>>) attributes {dimension_semantics = [#tpu.dimension_semantics<parallel>], iteration_bounds = array<i64: 1>, scalar_prefetch = 0 : i64, scratch_operands = 0 : i64, tpu.core_type = #tpu.core_type<tc>, window_params = [{transform_indices = @transform_0, window_bounds = array<i64: 1, 1024>}, {transform_indices = @transform_1, window_bounds = array<i64: 1, 1024>}]} {
    %c0 = arith.constant 0 : index
    %c0_0 = arith.constant 0 : index
    %0 = vector.load %arg1[%c0, %c0_0] : memref<1x1024xf32, #tpu.memory_space<vmem>>, vector<1x1024xf32>
    %c0_1 = arith.constant 0 : index
    %c0_2 = arith.constant 0 : index
    %1 = vector.load %arg2[%c0_1, %c0_2] : memref<1x1024xf32, #tpu.memory_space<vmem>>, vector<1x1024xf32>
    tpu.vector_store %arg2[%c0_1, %c0_2], %0 {strides = array<i32>} : memref<1x1024xf32, #tpu.memory_space<vmem>>, vector<1x1024xf32>,
    return
  }
  func.func @transform_0(%arg0: i32) -> (i32, i32) {
    %c0_i32 = arith.constant 0 : i32
    %c0_i32_0 = arith.constant 0 : i32
    return %arg0, %c0_i32 : i32, i32
  }
  func.func @transform_1(%arg0: i32) -> (i32, i32) {
    %c0_i32 = arith.constant 0 : i32
    %c0_i32_0 = arith.constant 0 : i32
    return %arg0, %c0_i32 : i32, i32
  }
}

</mosaic_0001>

<bundles_post_ra>
// kernel: tpu_custom_call.1
= control target key start
LH: loop header
LB: loop body
LE: loop exit
PB: predicated region body
PF: predicated region fallthrough
CT: control target
= control target key end

     0   :  { %6 = vsyncpa [#allocation3], 0  ;;  %s124_s0 = inlined_call_operand.hbm [shape: f32[1,1024], index: 0, kind: input, shape index: {}]   ;;  %s125_s1 = inlined_call_operand.hbm [shape: f32[1,1024], index: 1, kind: output, shape index: {}]  }
   0x1   :  { %7 = vsyncpa [#allocation4], 0  ;;  %s88_s6 = smov [#allocation2]   ;;  %s40_s10 = scalar_lea.hbm %s124_s0, 128 }
   0x2   :  { %s14_s7 = sshll.u32 %s88_s6, 4  ;;  %p41_p0 = scmp.ne.s32.totalorder %s124_s0, %s40_s10  ;;  %s15_s7 = int_to_ptr.vmem [resolvable:$true] %s14_s7 }
   0x3   :  { %p44_p1 = scmp.lt.u32.totalorder %s40_s10, %s124_s0 }
   0x5   :  { %p46_p2 = pnand %p44_p1, %p41_p0 }
   0x7   :  { %49 = shalt.err (!%p46_p2)
}
   0x8   :  { %s50_s15 = scalar_lea.vmem %s15_s7, 128  ;;  %p55_p4 = scmp.lt.s32.totalorder %s15_s7, %s15_s7 }
   0x9   :  { %p51_p3 = scmp.ne.s32.totalorder %s15_s7, %s50_s15  ;;  %p56_p5 = scmp.lt.s32.totalorder %s50_s15, %s50_s15 }
   0xb   :  { %p57_p6 = por %p56_p5, %p55_p4 }
   0xd   :  { %p58_p7 = pnand %p57_p6, %p51_p3 }
   0xf   :  { %61 = shalt.err (!%p58_p7)
}
  0x10   :  { %17 = dma.hbm_to_vmem [thread:$0]  %s124_s0, 128, %s15_s7, [#allocation3]  }
  0x11   :  { %84 = dma.done.wait [#allocation3], 128  }
  0x12   :  { %85 = vsyncadd [#allocation3], 4294967168  ;;  %s89_s18 = smov [#allocation5]   ;;  %v21_v0 = vld [vmem:[#allocation2] sm:$0xff] }
  0x13   :  { %s29_s19 = sshll.u32 %s89_s18, 4  ;;  %22 = vst [vmem:[#allocation5] sm:$0xff] %v21_v0  ;;  %s30_s19 = int_to_ptr.vmem [resolvable:$true] %s29_s19 }
  0x14   :  { %s62_s20 = scalar_lea.vmem %s30_s19, 128  ;;  %p67_p9 = scmp.lt.s32.totalorder %s30_s19, %s30_s19 }
  0x15   :  { %p63_p8 = scmp.ne.s32.totalorder %s30_s19, %s62_s20  ;;  %p68_p10 = scmp.lt.s32.totalorder %s62_s20, %s62_s20 }
  0x17   :  { %p69_p11 = por %p68_p10, %p67_p9 }
  0x19   :  { %p70_p12 = pnand %p69_p11, %p63_p8 }
  0x1b   :  { %73 = shalt.err (!%p70_p12)
}
  0x1c   :  { %s74_s23 = scalar_lea.hbm %s125_s1, 128 }
  0x1d   :  { %p75_p13 = scmp.ne.s32.totalorder %s125_s1, %s74_s23  ;;  %p78_p0 = scmp.lt.u32.totalorder %s74_s23, %s125_s1 }
  0x1f   :  { %p80_p1 = pnand %p78_p0, %p75_p13 }
  0x21   :  { %83 = shalt.err (!%p80_p1)
}
  0x22   :  { %32 = dma.vmem_to_hbm [thread:$0]  %s30_s19, 128, %s125_s1, [#allocation4]  }
  0x23   :  { %86 = dma.done.wait [#allocation4], 128  }
  0x24   :  { %87 = vsyncadd [#allocation4], 4294967168 }
  0x25   :  { %36 = vsyncpa [#allocation3], 1 }
  0x26   :  { %37 = vsyncpa [#allocation4], 1 }

</bundles_post_ra>
